<compile_context>
chip_gen: v6e
topology: v6e:2x2x1
jax: 0.10.0
libtpu: 0.0.40
codegen_flags: <defaults>
</compile_context>

<pallas_src>
import functools

import jax
import jax.numpy as jnp
from jax.experimental import pallas as pl
from jax.experimental.pallas import tpu as pltpu


def _round_up(n, m):
    return ((n + m - 1) // m) * m


def _mlp_kernel(num_outputs, x_ref, w1_ref, b1_ref, w2_ref, b2_ref, w3_ref, b3_ref,
                out_ref, val_ref):
    # x_ref:  [tile, obs_dim] f32 (natural width, cast to bf16 on-chip).
    # weights bf16, biases f32.
    # out_ref: [tile, OUT_PAD] bf16 lane-dense slab (logits + value col + zero pad).
    # val_ref: [tile, 1] f32 value column (kept full precision).
    x = x_ref[...].astype(jnp.bfloat16)
    h1 = jnp.tanh(
        jnp.dot(x, w1_ref[...], preferred_element_type=jnp.float32) + b1_ref[...]
    ).astype(jnp.bfloat16)
    h2 = jnp.tanh(
        jnp.dot(h1, w2_ref[...], preferred_element_type=jnp.float32) + b2_ref[...]
    ).astype(jnp.bfloat16)
    acc = jnp.dot(h2, w3_ref[...], preferred_element_type=jnp.float32) + b3_ref[...]
    out_ref[...] = acc.astype(out_ref.dtype)
    # Extract the fused value column exactly (one-hot mask + lane reduce, XLU slot).
    lane = jax.lax.broadcasted_iota(jnp.int32, acc.shape, dimension=1)
    val_ref[...] = jnp.sum(jnp.where(lane == num_outputs, acc, 0.0),
                           axis=1, keepdims=True)


def prepare_params(params):
    """One-time host-side prep: pad hidden/output feature dims to 128, pack the
    logits and value heads into one lane-dense slab, cast weights to bf16
    (biases stay f32).  The w1 K dim keeps its natural obs_dim so x needs no
    feature padding.  Zero padding is numerically exact (tanh(0)=0)."""
    obs_dim, hidden = params["w1"].shape
    num_outputs = params["w3"].shape[1]
    hid_p = _round_up(hidden, 128)
    out_p = _round_up(num_outputs + 1, 128)  # +1 column for the fused value head

    def pad2(a, rows, cols):
        return jnp.pad(a, ((0, rows - a.shape[0]), (0, cols - a.shape[1])))

    w3v = jnp.concatenate([params["w3"], params["wv"]], axis=1)  # [H, num_outputs+1]
    b3v = jnp.concatenate([params["b3"], params["bv"]], axis=1)  # [1, num_outputs+1]

    return {
        "w1": pad2(params["w1"], obs_dim, hid_p).astype(jnp.bfloat16),
        "b1": pad2(params["b1"], 1, hid_p).astype(jnp.float32),
        "w2": pad2(params["w2"], hid_p, hid_p).astype(jnp.bfloat16),
        "b2": pad2(params["b2"], 1, hid_p).astype(jnp.float32),
        "w3": pad2(w3v, hid_p, out_p).astype(jnp.bfloat16),
        "b3": pad2(b3v, 1, out_p).astype(jnp.float32),
    }


@functools.partial(jax.jit, static_argnames=("num_outputs", "batch_tile"))
def custom_fc_forward(x, packed, *, num_outputs, batch_tile=512):
    """x: [B, obs_dim] f32.  packed: output of prepare_params().
    Returns (logits [B, num_outputs] bf16, value [B] f32)."""
    B, obs_dim = x.shape
    hid_pad = packed["w1"].shape[1]
    out_pad = packed["w3"].shape[1]

    # Big batch tile to amortize per-grid-step overhead, but capped so the grid
    # has >= 2 parallel steps when B allows it (v7x: 2 TensorCores per chip).
    b8 = _round_up(B, 8)
    half = _round_up((b8 + 1) // 2, 8) if b8 >= 16 else b8
    tile = max(8, min(batch_tile, half))
    b_pad = _round_up(B, tile)
    grid = (b_pad // tile,)

    # Only the batch dim is padded (and only when needed); no feature pad, no cast.
    x_p = x if b_pad == B else jnp.pad(x, ((0, b_pad - B), (0, 0)))

    rep = lambda i: (0, 0)  # weights/biases replicated to every grid step

    flops = 2 * b_pad * (obs_dim * hid_pad + hid_pad * hid_pad + hid_pad * out_pad)
    weight_bytes = (2 * (obs_dim * hid_pad + hid_pad * hid_pad + hid_pad * out_pad)
                    + 4 * (2 * hid_pad + out_pad))
    bytes_accessed = (b_pad * obs_dim * 4          # x read (f32, natural width)
                      + weight_bytes               # weights/biases
                      + b_pad * out_pad * 2        # bf16 output slab
                      + b_pad * 4)                 # f32 value column

    out_slab, out_val = pl.pallas_call(
        functools.partial(_mlp_kernel, num_outputs),
        out_shape=(
            jax.ShapeDtypeStruct((b_pad, out_pad), jnp.bfloat16),
            jax.ShapeDtypeStruct((b_pad, 1), jnp.float32),
        ),
        grid_spec=pltpu.PrefetchScalarGridSpec(
            num_scalar_prefetch=0,
            grid=grid,
            in_specs=[
                pl.BlockSpec((tile, obs_dim), lambda i: (i, 0)),   # x tile (f32)
                pl.BlockSpec((obs_dim, hid_pad), rep),             # w1
                pl.BlockSpec((1, hid_pad), rep),                   # b1
                pl.BlockSpec((hid_pad, hid_pad), rep),             # w2
                pl.BlockSpec((1, hid_pad), rep),                   # b2
                pl.BlockSpec((hid_pad, out_pad), rep),             # w3 (+ value head)
                pl.BlockSpec((1, out_pad), rep),                   # b3 (+ value bias)
            ],
            out_specs=[
                pl.BlockSpec((tile, out_pad), lambda i: (i, 0)),   # bf16 slab
                pl.BlockSpec((tile, 1), lambda i: (i, 0)),         # f32 value col
            ],
        ),
        compiler_params=pltpu.CompilerParams(
            dimension_semantics=("parallel",),
        ),
        cost_estimate=pl.CostEstimate(
            flops=flops,
            transcendentals=2 * b_pad * hid_pad,
            bytes_accessed=bytes_accessed,
        ),
    )(
        x_p,
        packed["w1"], packed["b1"],
        packed["w2"], packed["b2"],
        packed["w3"], packed["b3"],
    )

    logits = out_slab[:B, :num_outputs]   # bf16 (downstream softmax tolerates it)
    value = out_val[:B, 0]                # f32
    return logits, value


def _reference_forward(x, params):
    # Emulates the kernel math: bf16 matmul inputs, f32 accumulation, f32 tanh.
    bf, f32 = jnp.bfloat16, jnp.float32

    def mm(a, w):
        return jnp.dot(a.astype(bf), w.astype(bf), preferred_element_type=f32)

    h1 = jnp.tanh(mm(x, params["w1"]) + params["b1"])
    h2 = jnp.tanh(mm(h1, params["w2"]) + params["b2"])
    logits = mm(h2, params["w3"]) + params["b3"]
    value = (mm(h2, params["wv"]) + params["bv"]).reshape(-1)
    return logits, value


def _init_params(key, obs_dim, hidden, num_outputs):
    # Deterministic synthetic init (TorchFC: two tanh hidden layers + logits + value head).
    k1, k2, k3, k4 = jax.random.split(key, 4)
    scale = lambda fan_in: 1.0 / jnp.sqrt(jnp.float32(fan_in))
    return {
        "w1": jax.random.normal(k1, (obs_dim, hidden), jnp.float32) * scale(obs_dim),
        "b1": jnp.zeros((1, hidden), jnp.float32),
        "w2": jax.random.normal(k2, (hidden, hidden), jnp.float32) * scale(hidden),
        "b2": jnp.zeros((1, hidden), jnp.float32),
        "w3": jax.random.normal(k3, (hidden, num_outputs), jnp.float32) * 0.01,
        "b3": jnp.zeros((1, num_outputs), jnp.float32),
        "wv": jax.random.normal(k4, (hidden, 1), jnp.float32) * 0.01,
        "bv": jnp.zeros((1, 1), jnp.float32),
    }


if __name__ == "__main__":
    # Small shapes consistent with the module: flat obs vector -> MLP -> action logits.
    # B=6 deliberately not a multiple of 8 to exercise the batch padding path.
    B, OBS_DIM, HIDDEN, NUM_OUTPUTS = 6, 32, 64, 16

    key = jax.random.PRNGKey(0)
    kx, kp = jax.random.split(key)
    x = jax.random.normal(kx, (B, OBS_DIM), jnp.float32)
    params = _init_params(kp, OBS_DIM, HIDDEN, NUM_OUTPUTS)

    packed = prepare_params(params)

    # TODO(synk): RLlib input_dict/state/seq_lens plumbing and sum_params() are
    # framework bookkeeping with no tensor compute; only the MLP forward is fused.
    logits, value = custom_fc_forward(x, packed, num_outputs=NUM_OUTPUTS)
    logits = jax.block_until_ready(logits)
    value = jax.block_until_ready(value)

    ref_logits, ref_value = _reference_forward(x, params)
    assert logits.shape == (B, NUM_OUTPUTS)
    assert value.shape == (B,)
    assert jnp.allclose(logits.astype(jnp.float32), ref_logits,
                        atol=1e-2, rtol=1e-2), "logits mismatch"
    assert jnp.allclose(value, ref_value, atol=5e-3, rtol=5e-3), "value mismatch"

    print("KERNEL_OK")
</pallas_src>

<mosaic_0001>
module attributes {stable_mosaic.version = 11 : i64} {
  func.func @_mlp_kernel(%arg0: i32, %arg1: memref<8x32xf32, #tpu.memory_space<vmem>>, %arg2: memref<32x128xbf16, #tpu.memory_space<vmem>>, %arg3: memref<1x128xf32, #tpu.memory_space<vmem>>, %arg4: memref<128x128xbf16, #tpu.memory_space<vmem>>, %arg5: memref<1x128xf32, #tpu.memory_space<vmem>>, %arg6: memref<128x128xbf16, #tpu.memory_space<vmem>>, %arg7: memref<1x128xf32, #tpu.memory_space<vmem>>, %arg8: memref<8x128xbf16, #tpu.memory_space<vmem>>, %arg9: memref<8x1xf32, #tpu.memory_space<vmem>>) attributes {dimension_semantics = [#tpu.dimension_semantics<parallel>], iteration_bounds = array<i64: 1>, scalar_prefetch = 0 : i64, scratch_operands = 0 : i64, tpu.core_type = #tpu.core_type<tc>, window_params = [{transform_indices = @transform_0, window_bounds = array<i64: 8, 32>}, {pipeline_mode = #tpu.pipeline_mode<synchronous>, transform_indices = @transform_1, window_bounds = array<i64: 32, 128>}, {pipeline_mode = #tpu.pipeline_mode<synchronous>, transform_indices = @transform_2, window_bounds = array<i64: 1, 128>}, {pipeline_mode = #tpu.pipeline_mode<synchronous>, transform_indices = @transform_3, window_bounds = array<i64: 128, 128>}, {pipeline_mode = #tpu.pipeline_mode<synchronous>, transform_indices = @transform_4, window_bounds = array<i64: 1, 128>}, {pipeline_mode = #tpu.pipeline_mode<synchronous>, transform_indices = @transform_5, window_bounds = array<i64: 128, 128>}, {pipeline_mode = #tpu.pipeline_mode<synchronous>, transform_indices = @transform_6, window_bounds = array<i64: 1, 128>}, {transform_indices = @transform_7, window_bounds = array<i64: 8, 128>}, {transform_indices = @transform_8, window_bounds = array<i64: 8, 1>}]} {
    %c0 = arith.constant 0 : index
    %c0_0 = arith.constant 0 : index
    %0 = vector.load %arg1[%c0, %c0_0] : memref<8x32xf32, #tpu.memory_space<vmem>>, vector<8x32xf32>
    %1 = arith.truncf %0 : vector<8x32xf32> to vector<8x32xbf16>
    %c0_1 = arith.constant 0 : index
    %c0_2 = arith.constant 0 : index
    %2 = vector.load %arg2[%c0_1, %c0_2] : memref<32x128xbf16, #tpu.memory_space<vmem>>, vector<32x128xbf16>
    %cst = arith.constant dense<0.000000e+00> : vector<8x128xf32>
    %3 = tpu.matmul %1, %2, %cst {dimension_numbers = #tpu.dot_dimension_numbers<[1], [0], [0], [1], [0, 0, 1, 1], [], []>} : vector<8x32xbf16>, vector<32x128xbf16>, vector<8x128xf32> -> vector<8x128xf32>
    %c0_3 = arith.constant 0 : index
    %c0_4 = arith.constant 0 : index
    %4 = vector.load %arg3[%c0_3, %c0_4] : memref<1x128xf32, #tpu.memory_space<vmem>>, vector<1x128xf32>
    %5 = vector.broadcast %4 : vector<1x128xf32> to vector<8x128xf32>
    %6 = arith.addf %3, %5 : vector<8x128xf32>
    %7 = math.tanh %6 : vector<8x128xf32>
    %8 = arith.truncf %7 : vector<8x128xf32> to vector<8x128xbf16>
    %c0_5 = arith.constant 0 : index
    %c0_6 = arith.constant 0 : index
    %9 = vector.load %arg4[%c0_5, %c0_6] : memref<128x128xbf16, #tpu.memory_space<vmem>>, vector<128x128xbf16>
    %cst_7 = arith.constant dense<0.000000e+00> : vector<8x128xf32>
    %10 = tpu.matmul %8, %9, %cst_7 {dimension_numbers = #tpu.dot_dimension_numbers<[1], [0], [0], [1], [0, 0, 1, 1], [], []>} : vector<8x128xbf16>, vector<128x128xbf16>, vector<8x128xf32> -> vector<8x128xf32>
    %c0_8 = arith.constant 0 : index
    %c0_9 = arith.constant 0 : index
    %11 = vector.load %arg5[%c0_8, %c0_9] : memref<1x128xf32, #tpu.memory_space<vmem>>, vector<1x128xf32>
    %12 = vector.broadcast %11 : vector<1x128xf32> to vector<8x128xf32>
    %13 = arith.addf %10, %12 : vector<8x128xf32>
    %14 = math.tanh %13 : vector<8x128xf32>
    %15 = arith.truncf %14 : vector<8x128xf32> to vector<8x128xbf16>
    %c0_10 = arith.constant 0 : index
    %c0_11 = arith.constant 0 : index
    %16 = vector.load %arg6[%c0_10, %c0_11] : memref<128x128xbf16, #tpu.memory_space<vmem>>, vector<128x128xbf16>
    %cst_12 = arith.constant dense<0.000000e+00> : vector<8x128xf32>
    %17 = tpu.matmul %15, %16, %cst_12 {dimension_numbers = #tpu.dot_dimension_numbers<[1], [0], [0], [1], [0, 0, 1, 1], [], []>} : vector<8x128xbf16>, vector<128x128xbf16>, vector<8x128xf32> -> vector<8x128xf32>
    %c0_13 = arith.constant 0 : index
    %c0_14 = arith.constant 0 : index
    %18 = vector.load %arg7[%c0_13, %c0_14] : memref<1x128xf32, #tpu.memory_space<vmem>>, vector<1x128xf32>
    %19 = vector.broadcast %18 : vector<1x128xf32> to vector<8x128xf32>
    %20 = arith.addf %17, %19 : vector<8x128xf32>
    %21 = arith.truncf %20 : vector<8x128xf32> to vector<8x128xbf16>
    %c0_15 = arith.constant 0 : index
    %c0_16 = arith.constant 0 : index
    %22 = vector.load %arg8[%c0_15, %c0_16] : memref<8x128xbf16, #tpu.memory_space<vmem>>, vector<8x128xbf16>
    tpu.vector_store %arg8[%c0_15, %c0_16], %21 {strides = array<i32>} : memref<8x128xbf16, #tpu.memory_space<vmem>>, vector<8x128xbf16>,
    %23 = tpu.iota {dimensions = array<i32: 1>} : vector<8x128xi32>
    %c16_i32 = arith.constant 16 : i32
    %24 = vector.broadcast %c16_i32 : i32 to vector<8x128xi32>
    %25 = arith.cmpi eq, %23, %24 : vector<8x128xi32>
    %cst_17 = arith.constant 0.000000e+00 : f32
    %26 = vector.broadcast %cst_17 : f32 to vector<8x128xf32>
    %27 = arith.select %25, %20, %26 : vector<8x128xi1>, vector<8x128xf32>
    %cst_18 = arith.constant dense<0.000000e+00> : vector<8xf32>
    %28 = vector.multi_reduction <add>, %27, %cst_18 [1] : vector<8x128xf32> to vector<8xf32>
    %29 = vector.shape_cast %28 : vector<8xf32> to vector<8x1xf32>
    %c0_19 = arith.constant 0 : index
    %c0_20 = arith.constant 0 : index
    %30 = vector.load %arg9[%c0_19, %c0_20] : memref<8x1xf32, #tpu.memory_space<vmem>>, vector<8x1xf32>
    tpu.vector_store %arg9[%c0_19, %c0_20], %29 {strides = array<i32>} : memref<8x1xf32, #tpu.memory_space<vmem>>, vector<8x1xf32>,
    return
  }
  func.func @transform_0(%arg0: i32) -> (i32, i32) {
    %c0_i32 = arith.constant 0 : i32
    %c0_i32_0 = arith.constant 0 : i32
    return %arg0, %c0_i32 : i32, i32
  }
  func.func @transform_1(%arg0: i32) -> (i32, i32) {
    %c0_i32 = arith.constant 0 : i32
    %c0_i32_0 = arith.constant 0 : i32
    %c0_i32_1 = arith.constant 0 : i32
    return %c0_i32, %c0_i32_0 : i32, i32
  }
  func.func @transform_2(%arg0: i32) -> (i32, i32) {
    %c0_i32 = arith.constant 0 : i32
    %c0_i32_0 = arith.constant 0 : i32
    %c0_i32_1 = arith.constant 0 : i32
    return %c0_i32, %c0_i32_0 : i32, i32
  }
  func.func @transform_3(%arg0: i32) -> (i32, i32) {
    %c0_i32 = arith.constant 0 : i32
    %c0_i32_0 = arith.constant 0 : i32
    %c0_i32_1 = arith.constant 0 : i32
    return %c0_i32, %c0_i32_0 : i32, i32
  }
  func.func @transform_4(%arg0: i32) -> (i32, i32) {
    %c0_i32 = arith.constant 0 : i32
    %c0_i32_0 = arith.constant 0 : i32
    %c0_i32_1 = arith.constant 0 : i32
    return %c0_i32, %c0_i32_0 : i32, i32
  }
  func.func @transform_5(%arg0: i32) -> (i32, i32) {
    %c0_i32 = arith.constant 0 : i32
    %c0_i32_0 = arith.constant 0 : i32
    %c0_i32_1 = arith.constant 0 : i32
    return %c0_i32, %c0_i32_0 : i32, i32
  }
  func.func @transform_6(%arg0: i32) -> (i32, i32) {
    %c0_i32 = arith.constant 0 : i32
    %c0_i32_0 = arith.constant 0 : i32
    %c0_i32_1 = arith.constant 0 : i32
    return %c0_i32, %c0_i32_0 : i32, i32
  }
  func.func @transform_7(%arg0: i32) -> (i32, i32) {
    %c0_i32 = arith.constant 0 : i32
    %c0_i32_0 = arith.constant 0 : i32
    return %arg0, %c0_i32 : i32, i32
  }
  func.func @transform_8(%arg0: i32) -> (i32, i32) {
    %c0_i32 = arith.constant 0 : i32
    %c0_i32_0 = arith.constant 0 : i32
    return %arg0, %c0_i32 : i32, i32
  }
}

</mosaic_0001>

<bundles_post_ra>
// kernel: custom_fc_forward.1
= control target key start
LH: loop header
LB: loop body
LE: loop exit
PB: predicated region body
PF: predicated region fallthrough
CT: control target
= control target key end

     0   :  { %14 = vsyncpa [#allocation3], 0  ;;  %s675_s0 = inlined_call_operand.vmem [shape: f32[8,32], index: 0, kind: input, shape index: {}]   ;;  %s676_s1 = inlined_call_operand.vmem [shape: bf16[32,128], index: 1, kind: input, shape index: {}]   ;;  %s677_s2 = inlined_call_operand.vmem [shape: f32[1,128], index: 2, kind: input, shape index: {}]   ;;  %s678_s3 = inlined_call_operand.hbm [shape: bf16[128,128], index: 3, kind: input, shape index: {}]   ;;  %s679_s4 = inlined_call_operand.vmem [shape: f32[1,128], index: 4, kind: input, shape index: {}]   ;;  %s680_s5 = inlined_call_operand.hbm [shape: bf16[128,128], index: 5, kind: input, shape index: {}]   ;;  %s681_s6 = inlined_call_operand.vmem [shape: f32[1,128], index: 6, kind: input, shape index: {}]   ;;  %s682_s7 = inlined_call_operand.hbm [shape: bf16[8,128], index: 7, kind: output, shape index: {0}]   ;;  %s683_s8 = inlined_call_operand.vmem [shape: f32[8,1], index: 8, kind: output, shape index: {1}]  }
   0x1   :  { %15 = vsyncpa [#allocation6], 0 }
   0x2   :  { %16 = vsyncpa [#allocation4], 0  ;;  %s569_s27 = smov [#allocation2]  }
   0x3   :  { %s28_s28 = sshll.u32 %s569_s27, 4  ;;  %s29_s28 = int_to_ptr.vmem [resolvable:$true] %s28_s28 }
   0x4   :  { %s511_s29 = scalar_lea.vmem %s29_s28, 1024  ;;  %p516_p1 = scmp.lt.s32.totalorder %s29_s28, %s29_s28 }
   0x5   :  { %p512_p0 = scmp.ne.s32.totalorder %s29_s28, %s511_s29  ;;  %p517_p2 = scmp.lt.s32.totalorder %s511_s29, %s511_s29 }
   0x7   :  { %p518_p3 = por %p517_p2, %p516_p1 }
   0x9   :  { %p519_p4 = pnand %p518_p3, %p512_p0 }
   0xb   :  { %522 = shalt.err (!%p519_p4)
}
   0xc   :  { %s570_s30 = smov 64   ;;  %s571_s9 = smov 4  }
   0xd   :  { %34 = dma.hbm_to_vmem [thread:$0]  %s678_s3, 1024, %s29_s28, [#allocation3], %s570_s30, %s570_s30, %s571_s9  }
   0xe   :  { %s572_s12 = smov [#allocation5]  }
   0xf   :  { %s42_s13 = sshll.u32 %s572_s12, 4  ;;  %s43_s13 = int_to_ptr.vmem [resolvable:$true] %s42_s13 }
  0x10   :  { %s531_s14 = scalar_lea.vmem %s43_s13, 1024  ;;  %p536_p6 = scmp.lt.s32.totalorder %s43_s13, %s43_s13 }
  0x11   :  { %p532_p5 = scmp.ne.s32.totalorder %s43_s13, %s531_s14  ;;  %p537_p7 = scmp.lt.s32.totalorder %s531_s14, %s531_s14 }
  0x13   :  { %p538_p8 = por %p537_p7, %p536_p6 }
  0x15   :  { %p539_p9 = pnand %p538_p8, %p532_p5 }
  0x17   :  { %542 = shalt.err (!%p539_p9)
}
  0x18   :  { %48 = dma.hbm_to_vmem [thread:$0]  %s680_s5, 1024, %s43_s13, [#allocation6], %s570_s30, %s570_s30, %s571_s9  }
  0x19   :  { %563 = dma.done.wait [#allocation3], 1024  }
  0x1a   :  { %564 = vsyncadd [#allocation3], 4294966272 }
  0x1b   :  { %565 = dma.done.wait [#allocation6], 1024  }
  0x1c   :  { %566 = vsyncadd [#allocation6], 4294966272  ;;  %v573_v0 = vmov 0.0   ;;  %vm574_vm0 = vmmov 0   ;;  %v481_v1 = vld [vmem:[%s676_s1 + $0x8] sm:$0xff]   ;;  %v482_v2 = vld [vmem:[%s676_s1] sm:$0xff]   ;;  %v355_v37 = vlaneseq }
  0x1d   :  { %426 = vmatprep.subr.bf16.mxu0 %v573_v0  ;;  %430 = vmatprep.mubr.msk.bf16.mxu0 %vm574_vm0, %v573_v0  ;;  %v58_v3 = vld [vmem:[%s675_s0] sm:$0xff]  ;;  %v483_v4 = vld [vmem:[#allocation2 + $0x38] sm:$0xff]   ;;  %vm83_vm1 = vcmask 261120   ;;  %v484_v6 = vld [vmem:[#allocation2 + $0x30] sm:$0xff]  }
  0x1e   :  { %434 = vmatprep.subr.bf16.mxu1 %v573_v0  ;;  %450 = vmatprep.mubr.msk.bf16.mxu1 %vm574_vm0, %v573_v0  ;;  %v59_v5 = vpack.c.bf16 %v58_v3, %v58_v3  ;;  %v485_v7 = vld [vmem:[#allocation2 + $0x28] sm:$0xff]   ;;  %v486_v8 = vld [vmem:[#allocation2 + $0x20] sm:$0xff]   ;;  %v487_v9 = vld [vmem:[#allocation2 + $0x18] sm:$0xff]   ;;  %v356_v38 = vand.u32 127, %v355_v37 }
  0x1f   :  { %427 = vmatpush3.bf16.msra.mxu0 %v481_v1  ;;  %435 = vmatpush3.bf16.msra.mxu1 %v483_v4  ;;  %v488_v10 = vld [vmem:[#allocation2 + $0x10] sm:$0xff]   ;;  %v489_v11 = vld [vmem:[#allocation2 + $0x8] sm:$0xff]   ;;  %v490_v12 = vld [vmem:[#allocation2] sm:$0xff]  }
  0x20   :  { %428 = vmatprep.subr.bf16.mxu0 %v573_v0  ;;  %436 = vmatprep.subr.bf16.mxu1 %v573_v0  ;;  %v491_v13 = vld [vmem:[#allocation5 + $0x38] sm:$0xff]   ;;  %v492_v14 = vld [vmem:[#allocation5 + $0x30] sm:$0xff]   ;;  %v493_v15 = vld [vmem:[#allocation5 + $0x28] sm:$0xff]   ;;  %vm357_vm2 = vcmp.eq.s32.totalorder %v356_v38, 16 }
  0x21   :  { %v383_v16 = vld [vmem:[%s677_s2] ss:$0 sm:$0xff]  ;;  %v495_v25 = vld [vmem:[#allocation5 + $0x18] sm:$0xff]   ;;  %v496_v26 = vld [vmem:[#allocation5 + $0x10] sm:$0xff]  }
  0x22   :  { %v494_v24 = vld [vmem:[#allocation5 + $0x20] sm:$0xff]   ;;  %v497_v27 = vld [vmem:[#allocation5 + $0x8] sm:$0xff]  }
  0x23   :  { %429 = vmatpush3.bf16.msra.mxu0 %v482_v2  ;;  %437 = vmatpush3.bf16.msra.mxu1 %v484_v6  ;;  %v498_v28 = vld [vmem:[#allocation5] sm:$0xff]  }
  0x24   :  { %454 = vmatprep.subr.bf16.mxu0 %v573_v0  ;;  %438 = vmatprep.subr.bf16.mxu1 %v573_v0  ;;  %v387_v29 = vld [vmem:[%s679_s4] ss:$0 sm:$0xff]  ;;  %s575_s4 = smov [#allocation7]  }
  0x25   :  { %v396_v39 = vld [vmem:[%s681_s6] ss:$0 sm:$0xff]  ;;  %s369_s24 = sshll.u32 %s575_s4, 4  ;;  %s370_s24 = int_to_ptr.vmem [resolvable:$true] %s369_s24 }
  0x26   :  { %431 = vmatmul.mubr.msk.bf16.vlgmr.msra.gmra.mxu0 %vm83_vm1, %v59_v5  ;;  %s543_s25 = scalar_lea.vmem %s370_s24, 64  ;;  %p548_p11 = scmp.lt.s32.totalorder %s370_s24, %s370_s24 }
  0x27   :  { %470 = vmatprep.mubr.msk.bf16.mxu0 %vm574_vm0, %v573_v0  ;;  %439 = vmatpush3.bf16.msra.mxu1 %v485_v7  ;;  %p544_p10 = scmp.ne.s32.totalorder %s370_s24, %s543_s25  ;;  %p549_p12 = scmp.lt.s32.totalorder %s543_s25, %s543_s25 }
  0x28   :  { %440 = vmatprep.subr.bf16.mxu1 %v573_v0  ;;  %455 = vmatpush3.bf16.msra.mxu0 %v491_v13 }
  0x29   :  { %456 = vmatprep.subr.bf16.mxu0 %v573_v0  ;;  %p550_p13 = por %p549_p12, %p548_p11 }
  0x2b   :  { %441 = vmatpush3.bf16.msra.mxu1 %v486_v8  ;;  %p551_p0 = pnand %p550_p13, %p544_p10 }
  0x2c   :  { %442 = vmatprep.subr.bf16.mxu1 %v573_v0  ;;  %457 = vmatpush3.bf16.msra.mxu0 %v492_v14 }
  0x2d   :  { %458 = vmatprep.subr.bf16.mxu0 %v573_v0 }
  0x2f   :  { %443 = vmatpush3.bf16.msra.mxu1 %v487_v9 }
  0x30   :  { %444 = vmatprep.subr.bf16.mxu1 %v573_v0  ;;  %459 = vmatpush3.bf16.msra.mxu0 %v493_v15 }
  0x31   :  { %460 = vmatprep.subr.bf16.mxu0 %v573_v0 }
  0x33   :  { %445 = vmatpush3.bf16.msra.mxu1 %v488_v10 }
  0x34   :  { %446 = vmatprep.subr.bf16.mxu1 %v573_v0  ;;  %461 = vmatpush3.bf16.msra.mxu0 %v494_v24 }
  0x35   :  { %462 = vmatprep.subr.bf16.mxu0 %v573_v0 }
  0x37   :  { %447 = vmatpush3.bf16.msra.mxu1 %v489_v11 }
  0x38   :  { %448 = vmatprep.subr.bf16.mxu1 %v573_v0  ;;  %463 = vmatpush3.bf16.msra.mxu0 %v495_v25 }
  0x39   :  { %464 = vmatprep.subr.bf16.mxu0 %v573_v0 }
  0x3b   :  { %449 = vmatpush3.bf16.msra.mxu1 %v490_v12 }
  0x3c   :  { %465 = vmatpush3.bf16.msra.mxu0 %v496_v26 }
  0x3d   :  { %466 = vmatprep.subr.bf16.mxu0 %v573_v0 }
  0x40   :  { %467 = vmatpush3.bf16.msra.mxu0 %v497_v27 }
  0x41   :  { %468 = vmatprep.subr.bf16.mxu0 %v573_v0 }
  0x44   :  { %469 = vmatpush3.bf16.msra.mxu0 %v498_v28 }
  0xe6   :  { %v121_v17 = vpop.f32.mrf.mxu0 }
  0xe7   :  { %v122_v18 = vadd.f32 %v383_v16, %v121_v17 }
  0xe8   :  { %v432_v19 = vpop.f32.mrf.mxu0 }
  0xe9   :  { %499 = vtanh.f32 %v122_v18 }
  0xea   :  { %v124_v20 = vpop.f32.mrf.mxu0 }
  0xec   :  { %v433_v21 = vpop.f32.mrf.mxu0 }
  0xf6   :  { %v500_v22 = vpop.eup %499 }
  0xf7   :  { %v128_v23 = vpack.c.bf16 %v500_v22, %v500_v22 }
  0xf9   :  { %451 = vmatmul.mubr.bf16.vlgmr.msra.gmra.mxu1 %v128_v23 }
 0x1b9   :  { %v234_v30 = vpop.f32.mrf.mxu1 }
 0x1ba   :  { %v235_v31 = vadd.f32 %v387_v29, %v234_v30 }
 0x1bb   :  { %v452_v32 = vpop.f32.mrf.mxu1 }
 0x1bc   :  { %501 = vtanh.f32 %v235_v31 }
 0x1bd   :  { %v237_v33 = vpop.f32.mrf.mxu1 }
 0x1bf   :  { %v453_v34 = vpop.f32.mrf.mxu1 }
 0x1c9   :  { %v502_v35 = vpop.eup %501 }
 0x1ca   :  { %v241_v36 = vpack.c.bf16 %v502_v35, %v502_v35 }
 0x1cc   :  { %471 = vmatmul.mubr.bf16.vlgmr.msra.gmra.mxu0 %v241_v36 }
 0x28c   :  { %v347_v40 = vpop.f32.mrf.mxu0 }
 0x28d   :  { %v348_v41 = vadd.f32 %v396_v39, %v347_v40 }
 0x28e   :  { %v472_v42 = vpop.f32.mrf.mxu0 }
 0x28f   :  { %v353_v43 = vpack.c.bf16 %v348_v41, %v348_v41  ;;  %v358_v44 = vsel %vm357_vm2, %v348_v41, 0.0 }
 0x290   :  { %v350_v45 = vpop.f32.mrf.mxu0  ;;  %359 = vadd.xlane.f32.xlu0 %v358_v44 }
 0x291   :  { %354 = vst [vmem:[#allocation7] sm:$0xf] %v353_v43 }
 0x292   :  { %v473_v46 = vpop.f32.mrf.mxu0 }
 0x293   :  { %554 = shalt.err (!%p551_p0)
}
 0x294   :  { %372 = dma.vmem_to_hbm [thread:$0]  %s370_s24, 64, %s682_s7, [#allocation4]   ;;  %vm361_vm3 = vcmask 7168  }
 0x319   :  { %v360_v47 = vpop.xlane.xlu0 %359 }
 0x31a   :  { %362 = vst.msk [vmem:[%s683_s8] sm:$0xff] %vm361_vm3, %v360_v47 }
 0x31b   :  { %567 = dma.done.wait [#allocation4], 64  }
 0x31c   :  { %568 = vsyncadd [#allocation4], 4294967232 }
 0x31d   :  { %380 = vsyncpa [#allocation3], 1 }
 0x31e   :  { %381 = vsyncpa [#allocation6], 1 }
 0x31f   :  { %382 = vsyncpa [#allocation4], 1 }

</bundles_post_ra>
